<compile_context>
chip_gen: v7x
topology: tpu7x:2x2x1
jax: 0.10.0
libtpu: 0.0.40
codegen_flags: <defaults>
</compile_context>

<pallas_src>
import functools

import jax
import jax.numpy as jnp
from jax.experimental import pallas as pl
from jax.experimental.pallas import tpu as pltpu

# MLP dims from the PyTorch module: 93 -> 64 -> 32 -> 16 -> 9
D_IN, D1, D2, D3, D_OUT = 93, 64, 32, 16, 9

# Packed-parameter layout:
#   w_slab (512, 128):  rows   0: 93 cols 0:64  -> W1
#                       rows 128:192 cols 0:32  -> W2
#                       rows 256:288 cols 0:16  -> W3
#                       rows 384:400 cols 0: 9  -> W4     (rest zeros)
#   b_slab (  8, 128):  row 0 -> b1, row 1 -> b2, row 2 -> b3, row 3 -> b4 (f32)
_W_SLAB_ROWS = 4 * 128
_B_SLAB_ROWS = 8


def mlp_kernel(x_ref, w_ref, b_ref, o_ref):
    cdt = w_ref.dtype                     # MXU input dtype: f32 (exact) or bf16
    x = x_ref[...].astype(cdt)            # (tile_m, 93)
    b = b_ref[...]                        # (8, 128) f32

    # linear1 + ReLU   (K=93, N=128 padded; cols >= 64 stay exactly 0)
    h = jnp.dot(x, w_ref[0:D_IN, :], preferred_element_type=jnp.float32) + b[0:1, :]
    h = jnp.maximum(h, 0.0).astype(cdt)
    # linear2 + ReLU
    h = jnp.dot(h, w_ref[128:256, :], preferred_element_type=jnp.float32) + b[1:2, :]
    h = jnp.maximum(h, 0.0).astype(cdt)
    # linear3 + ReLU
    h = jnp.dot(h, w_ref[256:384, :], preferred_element_type=jnp.float32) + b[2:3, :]
    h = jnp.maximum(h, 0.0).astype(cdt)
    # linear4 (no activation)
    h = jnp.dot(h, w_ref[384:512, :], preferred_element_type=jnp.float32) + b[3:4, :]

    o_ref[...] = h[:, :D_OUT].astype(o_ref.dtype)


def _pick_tile_m(batch, tile_m_max=2048):
    """Batch-tile heuristic.

    Small batches: one tile, rounded up only to the 8-row sublane granule
    (no dead 512-row tile for inference-sized batches).
    Large batches: tiles up to tile_m_max, multiples of 256 (MXU height),
    sized so the grid has >= 4 steps (>= 2 per TensorCore on v7x).
    """
    if batch <= tile_m_max:
        return max(8, -(-batch // 8) * 8)
    t = -(-batch // 4)                      # aim for >= 4 grid steps
    t = -(-t // 256) * 256                  # round up to a 256-row multiple
    return min(tile_m_max, t)


@functools.partial(jax.jit, static_argnames=("tile_m",))
def _mlp_forward_impl(x, w_slab, b_slab, *, tile_m):
    B = x.shape[0]
    grid_m = pl.cdiv(B, tile_m)

    # Advisory cost for XLA's scheduler (padded-lane flops actually executed).
    flops = 2 * grid_m * tile_m * (D_IN * 128 + 3 * 128 * 128)
    bytes_acc = (B * (D_IN + D_OUT) * 4
                 + int(w_slab.size) * w_slab.dtype.itemsize
                 + int(b_slab.size) * 4)

    # x/out VMEM blocks are lane-padded to 128 and double-buffered; only need an
    # explicit limit when sweeping tile_m past ~4K (v7x has 64 MiB physical VMEM).
    vmem_limit = None
    if tile_m > 4096:
        vmem_limit = int(6 * tile_m * 128 * 4) + (8 << 20)

    return pl.pallas_call(
        mlp_kernel,
        out_shape=jax.ShapeDtypeStruct((B, D_OUT), jnp.float32),
        grid_spec=pltpu.PrefetchScalarGridSpec(
            num_scalar_prefetch=0,
            grid=(grid_m,),
            in_specs=[
                pl.BlockSpec((tile_m, D_IN), lambda i: (i, 0)),
                # param slabs: same block every step -> stay VMEM-resident
                pl.BlockSpec((_W_SLAB_ROWS, 128), lambda i: (0, 0)),
                pl.BlockSpec((_B_SLAB_ROWS, 128), lambda i: (0, 0)),
            ],
            out_specs=pl.BlockSpec((tile_m, D_OUT), lambda i: (i, 0)),
        ),
        compiler_params=pltpu.CompilerParams(
            # independent batch tiles: megacore / 2-TC sharding on v7x
            dimension_semantics=("parallel",),
            vmem_limit_bytes=vmem_limit),
        cost_estimate=pl.CostEstimate(
            flops=flops, transcendentals=0, bytes_accessed=bytes_acc),
    )(x, w_slab, b_slab)


def mlp_forward(x, w_slab, b_slab, tile_m=None):
    """y = MLP(x).  Any batch size works; the ragged last tile is handled by
    Pallas boundary-block clipping (no jnp.pad HBM round-trip)."""
    if tile_m is None:
        tile_m = _pick_tile_m(x.shape[0])
    return _mlp_forward_impl(x, w_slab, b_slab, tile_m=tile_m)


def init_params(key):
    """Deterministic init mimicking PyTorch nn.Linear default:
    U(-1/sqrt(fan_in), 1/sqrt(fan_in)) for weight and bias.
    Weights stored as (in, out); biases as (1, out)."""
    dims = [(D_IN, D1), (D1, D2), (D2, D3), (D3, D_OUT)]
    params = []
    for (fan_in, fan_out) in dims:
        key, kw, kb = jax.random.split(key, 3)
        bound = 1.0 / jnp.sqrt(jnp.float32(fan_in))
        w = jax.random.uniform(kw, (fan_in, fan_out), jnp.float32, -bound, bound)
        b = jax.random.uniform(kb, (1, fan_out), jnp.float32, -bound, bound)
        params.extend([w, b])
    return tuple(params)


def pack_params(params, dtype=jnp.float32):
    """Pack 4 (w, b) pairs into the zero-padded VMEM slabs (done once).

    `params` weights must be (in, out).  `dtype` controls the weight-slab dtype:
    jnp.float32 for exact numerics, jnp.bfloat16 for v5e MXU throughput
    (accumulation stays f32; biases stay f32)."""
    w1, b1, w2, b2, w3, b3, w4, b4 = params
    w_slab = jnp.zeros((_W_SLAB_ROWS, 128), jnp.float32)
    w_slab = w_slab.at[0:D_IN, 0:D1].set(w1)
    w_slab = w_slab.at[128:128 + D1, 0:D2].set(w2)
    w_slab = w_slab.at[256:256 + D2, 0:D3].set(w3)
    w_slab = w_slab.at[384:384 + D3, 0:D_OUT].set(w4)

    b_slab = jnp.zeros((_B_SLAB_ROWS, 128), jnp.float32)
    b_slab = b_slab.at[0, 0:D1].set(b1.reshape(-1))
    b_slab = b_slab.at[1, 0:D2].set(b2.reshape(-1))
    b_slab = b_slab.at[2, 0:D3].set(b3.reshape(-1))
    b_slab = b_slab.at[3, 0:D_OUT].set(b4.reshape(-1))
    return w_slab.astype(dtype), b_slab


def pack_torch_params(torch_params, dtype=jnp.float32):
    """Same as pack_params but takes PyTorch nn.Linear layout: weight (out, in)."""
    w1, b1, w2, b2, w3, b3, w4, b4 = torch_params
    return pack_params(
        (w1.T, jnp.reshape(b1, (1, -1)), w2.T, jnp.reshape(b2, (1, -1)),
         w3.T, jnp.reshape(b3, (1, -1)), w4.T, jnp.reshape(b4, (1, -1))),
        dtype=dtype)


def mlp_reference(x, params):
    w1, b1, w2, b2, w3, b3, w4, b4 = params
    h = jnp.maximum(x @ w1 + b1, 0.0)
    h = jnp.maximum(h @ w2 + b2, 0.0)
    h = jnp.maximum(h @ w3 + b3, 0.0)
    return h @ w4 + b4


if __name__ == "__main__":
    key = jax.random.PRNGKey(0)
    k_x, k_p = jax.random.split(key)

    batch = 8
    x = jax.random.normal(k_x, (batch, D_IN), jnp.float32)
    params = init_params(k_p)
    ref = mlp_reference(x, params)

    # Exact-f32 path.
    w32, b32 = pack_params(params, jnp.float32)
    out = mlp_forward(x, w32, b32)
    jax.block_until_ready(out)
    assert out.shape == (batch, D_OUT)
    assert jnp.allclose(out, ref, atol=1e-5, rtol=1e-5), "f32 mismatch vs reference"

    # bf16-weight path (v5e MXU throughput; looser tolerance by construction).
    wbf, bbf = pack_params(params, jnp.bfloat16)
    out_bf = mlp_forward(x, wbf, bbf)
    jax.block_until_ready(out_bf)
    assert jnp.allclose(out_bf, ref, atol=5e-2, rtol=5e-2), "bf16 mismatch vs reference"

    print("KERNEL_OK")
</pallas_src>

<mosaic_0001>
module attributes {stable_mosaic.version = 11 : i64} {
  func.func @mlp_kernel(%arg0: i32, %arg1: memref<8x93xf32, #tpu.memory_space<vmem>>, %arg2: memref<512x128xf32, #tpu.memory_space<vmem>>, %arg3: memref<8x128xf32, #tpu.memory_space<vmem>>, %arg4: memref<8x9xf32, #tpu.memory_space<vmem>>) attributes {dimension_semantics = [#tpu.dimension_semantics<parallel>], iteration_bounds = array<i64: 1>, scalar_prefetch = 0 : i64, scratch_operands = 0 : i64, tpu.core_type = #tpu.core_type<tc>, window_params = [{transform_indices = @transform_0, window_bounds = array<i64: 8, 93>}, {pipeline_mode = #tpu.pipeline_mode<synchronous>, transform_indices = @transform_1, window_bounds = array<i64: 512, 128>}, {pipeline_mode = #tpu.pipeline_mode<synchronous>, transform_indices = @transform_2, window_bounds = array<i64: 8, 128>}, {transform_indices = @transform_3, window_bounds = array<i64: 8, 9>}]} {
    %c0 = arith.constant 0 : index
    %c0_0 = arith.constant 0 : index
    %0 = vector.load %arg1[%c0, %c0_0] : memref<8x93xf32, #tpu.memory_space<vmem>>, vector<8x93xf32>
    %c0_1 = arith.constant 0 : index
    %c0_2 = arith.constant 0 : index
    %1 = vector.load %arg3[%c0_1, %c0_2] : memref<8x128xf32, #tpu.memory_space<vmem>>, vector<8x128xf32>
    %c0_3 = arith.constant 0 : index
    %c0_4 = arith.constant 0 : index
    %2 = vector.load %arg2[%c0_3, %c0_4] : memref<512x128xf32, #tpu.memory_space<vmem>>, vector<93x128xf32>
    %cst = arith.constant dense<0.000000e+00> : vector<8x128xf32>
    %3 = tpu.matmul %0, %2, %cst {dimension_numbers = #tpu.dot_dimension_numbers<[1], [0], [0], [1], [0, 0, 1, 1], [], []>} : vector<8x93xf32>, vector<93x128xf32>, vector<8x128xf32> -> vector<8x128xf32>
    %4 = vector.extract_strided_slice %1 {offsets = [0, 0], sizes = [1, 128], strides = [1, 1]} : vector<8x128xf32> to vector<1x128xf32>
    %5 = vector.broadcast %4 : vector<1x128xf32> to vector<8x128xf32>
    %6 = arith.addf %3, %5 : vector<8x128xf32>
    %cst_5 = arith.constant 0.000000e+00 : f32
    %7 = vector.broadcast %cst_5 : f32 to vector<8x128xf32>
    %8 = arith.maximumf %6, %7 : vector<8x128xf32>
    %c128 = arith.constant 128 : index
    %c0_6 = arith.constant 0 : index
    %9 = vector.load %arg2[%c128, %c0_6] : memref<512x128xf32, #tpu.memory_space<vmem>>, vector<128x128xf32>
    %cst_7 = arith.constant dense<0.000000e+00> : vector<8x128xf32>
    %10 = tpu.matmul %8, %9, %cst_7 {dimension_numbers = #tpu.dot_dimension_numbers<[1], [0], [0], [1], [0, 0, 1, 1], [], []>} : vector<8x128xf32>, vector<128x128xf32>, vector<8x128xf32> -> vector<8x128xf32>
    %11 = vector.extract_strided_slice %1 {offsets = [1, 0], sizes = [1, 128], strides = [1, 1]} : vector<8x128xf32> to vector<1x128xf32>
    %12 = vector.broadcast %11 : vector<1x128xf32> to vector<8x128xf32>
    %13 = arith.addf %10, %12 : vector<8x128xf32>
    %cst_8 = arith.constant 0.000000e+00 : f32
    %14 = vector.broadcast %cst_8 : f32 to vector<8x128xf32>
    %15 = arith.maximumf %13, %14 : vector<8x128xf32>
    %c256 = arith.constant 256 : index
    %c0_9 = arith.constant 0 : index
    %16 = vector.load %arg2[%c256, %c0_9] : memref<512x128xf32, #tpu.memory_space<vmem>>, vector<128x128xf32>
    %cst_10 = arith.constant dense<0.000000e+00> : vector<8x128xf32>
    %17 = tpu.matmul %15, %16, %cst_10 {dimension_numbers = #tpu.dot_dimension_numbers<[1], [0], [0], [1], [0, 0, 1, 1], [], []>} : vector<8x128xf32>, vector<128x128xf32>, vector<8x128xf32> -> vector<8x128xf32>
    %18 = vector.extract_strided_slice %1 {offsets = [2, 0], sizes = [1, 128], strides = [1, 1]} : vector<8x128xf32> to vector<1x128xf32>
    %19 = vector.broadcast %18 : vector<1x128xf32> to vector<8x128xf32>
    %20 = arith.addf %17, %19 : vector<8x128xf32>
    %cst_11 = arith.constant 0.000000e+00 : f32
    %21 = vector.broadcast %cst_11 : f32 to vector<8x128xf32>
    %22 = arith.maximumf %20, %21 : vector<8x128xf32>
    %c384 = arith.constant 384 : index
    %c0_12 = arith.constant 0 : index
    %23 = vector.load %arg2[%c384, %c0_12] : memref<512x128xf32, #tpu.memory_space<vmem>>, vector<128x128xf32>
    %cst_13 = arith.constant dense<0.000000e+00> : vector<8x128xf32>
    %24 = tpu.matmul %22, %23, %cst_13 {dimension_numbers = #tpu.dot_dimension_numbers<[1], [0], [0], [1], [0, 0, 1, 1], [], []>} : vector<8x128xf32>, vector<128x128xf32>, vector<8x128xf32> -> vector<8x128xf32>
    %25 = vector.extract_strided_slice %1 {offsets = [3, 0], sizes = [1, 128], strides = [1, 1]} : vector<8x128xf32> to vector<1x128xf32>
    %26 = vector.broadcast %25 : vector<1x128xf32> to vector<8x128xf32>
    %27 = arith.addf %24, %26 : vector<8x128xf32>
    %28 = vector.extract_strided_slice %27 {offsets = [0, 0], sizes = [8, 9], strides = [1, 1]} : vector<8x128xf32> to vector<8x9xf32>
    %c0_14 = arith.constant 0 : index
    %c0_15 = arith.constant 0 : index
    %29 = vector.load %arg4[%c0_14, %c0_15] : memref<8x9xf32, #tpu.memory_space<vmem>>, vector<8x9xf32>
    tpu.vector_store %arg4[%c0_14, %c0_15], %28 {strides = array<i32>} : memref<8x9xf32, #tpu.memory_space<vmem>>, vector<8x9xf32>,
    return
  }
  func.func @transform_0(%arg0: i32) -> (i32, i32) {
    %c0_i32 = arith.constant 0 : i32
    %c0_i32_0 = arith.constant 0 : i32
    return %arg0, %c0_i32 : i32, i32
  }
  func.func @transform_1(%arg0: i32) -> (i32, i32) {
    %c0_i32 = arith.constant 0 : i32
    %c0_i32_0 = arith.constant 0 : i32
    %c0_i32_1 = arith.constant 0 : i32
    return %c0_i32, %c0_i32_0 : i32, i32
  }
  func.func @transform_2(%arg0: i32) -> (i32, i32) {
    %c0_i32 = arith.constant 0 : i32
    %c0_i32_0 = arith.constant 0 : i32
    %c0_i32_1 = arith.constant 0 : i32
    return %c0_i32, %c0_i32_0 : i32, i32
  }
  func.func @transform_3(%arg0: i32) -> (i32, i32) {
    %c0_i32 = arith.constant 0 : i32
    %c0_i32_0 = arith.constant 0 : i32
    return %arg0, %c0_i32 : i32, i32
  }
}

</mosaic_0001>

<bundles_post_ra>
// kernel: _mlp_forward_impl.1
= control target key start
LH: loop header
LB: loop body
LE: loop exit
PB: predicated region body
PF: predicated region fallthrough
CT: control target
= control target key end

     0   :  { %8 = vsyncpa [#allocation3], 0  ;;  %s960_s0 = inlined_call_operand.hbm [shape: f32[8,93], index: 0, kind: input, shape index: {}]   ;;  %s961_s1 = inlined_call_operand.hbm [shape: f32[512,128], index: 1, kind: input, shape index: {}]   ;;  %s962_s2 = inlined_call_operand.hbm [shape: f32[8,128], index: 2, kind: input, shape index: {}]   ;;  %s963_s3 = inlined_call_operand.hbm [shape: f32[8,9], index: 3, kind: output, shape index: {}]  }
   0x1   :  { %9 = vsyncpa [#allocation6], 0 }
   0x2   :  { %10 = vsyncpa [#allocation4], 0  ;;  %s832_s12 = smov [#allocation5]   ;;  %s738_s16 = scalar_lea.hbm %s961_s1, 8192 }
   0x3   :  { %s26_s13 = sshll.u32 %s832_s12, 4  ;;  %p739_p0 = scmp.ne.s32.totalorder %s961_s1, %s738_s16  ;;  %s27_s13 = int_to_ptr.vmem [resolvable:$true] %s26_s13 }
   0x4   :  { %p742_p1 = scmp.lt.u32.totalorder %s738_s16, %s961_s1 }
   0x6   :  { %p744_p2 = pnand %p742_p1, %p739_p0 }
   0x8   :  { %747 = shalt.err (!%p744_p2)
}
   0x9   :  { %s748_s21 = scalar_lea.vmem %s27_s13, 8192  ;;  %p753_p4 = scmp.lt.s32.totalorder %s27_s13, %s27_s13 }
   0xa   :  { %p749_p3 = scmp.ne.s32.totalorder %s27_s13, %s748_s21  ;;  %p754_p5 = scmp.lt.s32.totalorder %s748_s21, %s748_s21 }
   0xc   :  { %p755_p6 = por %p754_p5, %p753_p4 }
   0xe   :  { %p756_p7 = pnand %p755_p6, %p749_p3 }
  0x10   :  { %759 = shalt.err (!%p756_p7)
}
  0x11   :  { %s833_s22 = smov 128   ;;  %s834_s23 = smov 8  }
  0x12   :  { %32 = dma.hbm_to_vmem [thread:$0]  %s961_s1, 8192, %s27_s13, [#allocation6], %s833_s22, %s833_s22, %s834_s23  }
  0x13   :  { %s835_s26 = smov [#allocation2]   ;;  %s836_s28 = smov [#allocation7]  }
  0x14   :  { %s17_s27 = sshll.u32 %s835_s26, 4  ;;  %s39_s29 = sshll.u32 %s836_s28, 4  ;;  %s18_s27 = int_to_ptr.vmem [resolvable:$true] %s17_s27  ;;  %s40_s29 = int_to_ptr.vmem [resolvable:$true] %s39_s29 }
  0x15   :  { %s760_s5 = scalar_lea.hbm %s960_s0, 128 }
  0x16   :  { %p761_p8 = scmp.ne.s32.totalorder %s960_s0, %s760_s5  ;;  %p764_p9 = scmp.lt.u32.totalorder %s760_s5, %s960_s0 }
  0x18   :  { %p766_p10 = pnand %p764_p9, %p761_p8 }
  0x1a   :  { %769 = shalt.err (!%p766_p10)
}
  0x1b   :  { %s770_s1 = scalar_lea.vmem %s18_s27, 128  ;;  %p775_p12 = scmp.lt.s32.totalorder %s18_s27, %s18_s27 }
  0x1c   :  { %p771_p11 = scmp.ne.s32.totalorder %s18_s27, %s770_s1  ;;  %p776_p13 = scmp.lt.s32.totalorder %s770_s1, %s770_s1 }
  0x1e   :  { %p777_p0 = por %p776_p13, %p775_p12 }
  0x20   :  { %p778_p1 = pnand %p777_p0, %p771_p11 }
  0x22   :  { %781 = shalt.err (!%p778_p1)
}
  0x23   :  { %20 = dma.hbm_to_vmem [thread:$0]  %s960_s0, 128, %s18_s27, [#allocation3]  }
  0x24   :  { %s782_s14 = scalar_lea.hbm %s962_s2, 128 }
  0x25   :  { %p783_p2 = scmp.ne.s32.totalorder %s962_s2, %s782_s14  ;;  %p786_p3 = scmp.lt.u32.totalorder %s782_s14, %s962_s2 }
  0x27   :  { %p788_p4 = pnand %p786_p3, %p783_p2 }
  0x29   :  { %791 = shalt.err (!%p788_p4)
}
  0x2a   :  { %s792_s19 = scalar_lea.vmem %s40_s29, 128  ;;  %p797_p6 = scmp.lt.s32.totalorder %s40_s29, %s40_s29 }
  0x2b   :  { %p793_p5 = scmp.ne.s32.totalorder %s40_s29, %s792_s19  ;;  %p798_p7 = scmp.lt.s32.totalorder %s792_s19, %s792_s19 }
  0x2d   :  { %p799_p8 = por %p798_p7, %p797_p6 }
  0x2f   :  { %p800_p9 = pnand %p799_p8, %p793_p5 }
  0x31   :  { %803 = shalt.err (!%p800_p9)
}
  0x32   :  { %42 = dma.hbm_to_vmem [thread:$0]  %s962_s2, 128, %s40_s29, [#allocation6]  }
  0x33   :  { %826 = dma.done.wait [#allocation3], 128  }
  0x34   :  { %827 = vsyncadd [#allocation3], 4294967168 }
  0x35   :  { %828 = dma.done.wait [#allocation6], 8320  }
  0x36   :  { %829 = vsyncadd [#allocation6], 4294958976  ;;  %v837_v0 = vmov 0.0|0.0   ;;  %vm838_vm0 = vmmov 0   ;;  %v839_v1 = vmov 0.0   ;;  %v54_v2 = vld [vmem:[#allocation5] sm:$0xff] }
  0x37   :  { %637 = vmatprep.subr.bf16.mxu0 %v837_v0  ;;  %656 = vmatprep.subr.bf16.mxu1 %v837_v0  ;;  %v55_v3 = vld [vmem:[#allocation5 + $0x8] sm:$0xff]  ;;  %v56_v4 = vld [vmem:[#allocation5 + $0x10] sm:$0xff]  ;;  %v57_v6 = vld [vmem:[#allocation5 + $0x18] sm:$0xff]  ;;  %vm74_vm1 = vcmask 1044480   ;;  %vm840_vm2 = vmmov 1   ;;  %vm70_vm4 = vcmask 760832  }
  0x38   :  { %529 = vmatprep.mubr.msk.f32.mxu0 %vm838_vm0, %v839_v1  ;;  %564 = vmatprep.mubr.msk.f32.mxu1 %vm838_vm0, %v839_v1  ;;  %v638_v5 = vpack.c.bf16 %v55_v3, %v54_v2  ;;  %v641_v7 = vpack.c.bf16 %v57_v6, %v56_v4  ;;  %v58_v8 = vld [vmem:[#allocation5 + $0x20] sm:$0xff]  ;;  %v59_v9 = vld [vmem:[#allocation5 + $0x28] sm:$0xff]  ;;  %v151_v13 = vld [vmem:[#allocation5 + $0x90] sm:$0xff]  ;;  %v66_v4 = vlaneseq  ;;  %s841_s2 = smov [#allocation8]   ;;  %vm421_vm5 = vcmask 72704  }
  0x39   :  { %v149_v10 = vld [vmem:[#allocation5 + $0x80] sm:$0xff]  ;;  %v150_v11 = vld [vmem:[#allocation5 + $0x88] sm:$0xff]  ;;  %v152_v14 = vld [vmem:[#allocation5 + $0x98] sm:$0xff]  ;;  %v644_v15 = vpack.c.bf16 %v59_v9, %v58_v8  ;;  %s429_s21 = sshll.u32 %s841_s2, 4  ;;  %s430_s21 = int_to_ptr.vmem [resolvable:$true] %s429_s21 }
  0x3a   :  { %639 = vmatpush3.bf16.msra.mxu0 %v638_v5  ;;  %v657_v12 = vpack.c.bf16 %v150_v11, %v149_v10  ;;  %v60_v16 = vld [vmem:[#allocation5 + $0x30] sm:$0xff]  ;;  %v660_v17 = vpack.c.bf16 %v152_v14, %v151_v13  ;;  %v61_v18 = vld [vmem:[#allocation5 + $0x38] sm:$0xff]  ;;  %v153_v19 = vld [vmem:[#allocation5 + $0xa0] sm:$0xff]  ;;  %v927_v5 = vshrl.u32 %v66_v4, 7  ;;  %s804_s22 = scalar_lea.vmem %s430_s21, 128  ;;  %p809_p11 = scmp.lt.s32.totalorder %s430_s21, %s430_s21 }
  0x3b   :  { %640 = vmatprep.subr.bf16.mxu0 %v837_v0  ;;  %v154_v20 = vld [vmem:[#allocation5 + $0xa8] sm:$0xff]  ;;  %v647_v21 = vpack.c.bf16 %v61_v18, %v60_v16  ;;  %v62_v22 = vld [vmem:[#allocation5 + $0x40] sm:$0xff]  ;;  %v155_v25 = vld [vmem:[#allocation5 + $0xb0] sm:$0xff]  ;;  %p805_p10 = scmp.ne.s32.totalorder %s430_s21, %s804_s22  ;;  %p810_p12 = scmp.lt.s32.totalorder %s804_s22, %s804_s22 }
  0x3c   :  { %658 = vmatpush3.bf16.msra.mxu1 %v657_v12  ;;  %v663_v23 = vpack.c.bf16 %v154_v20, %v153_v19  ;;  %v63_v24 = vld [vmem:[#allocation5 + $0x48] sm:$0xff]  ;;  %v156_v26 = vld [vmem:[#allocation5 + $0xb8] sm:$0xff]  ;;  %v64_v28 = vld [vmem:[#allocation5 + $0x50] sm:$0xff]  ;;  %v68_v6 = vsub.s32 0, %v927_v5 }
  0x3d   :  { %659 = vmatprep.subr.bf16.mxu1 %v837_v0  ;;  %v650_v27 = vpack.c.bf16 %v63_v24, %v62_v22  ;;  %v666_v29 = vpack.c.bf16 %v156_v26, %v155_v25  ;;  %v65_v30 = vld [vmem:[#allocation5 + $0x58] sm:$0x1f]  ;;  %v157_v31 = vld [vmem:[#allocation5 + $0xc0] sm:$0xff]  ;;  %v158_v32 = vld [vmem:[#allocation5 + $0xc8] sm:$0xff]  ;;  %p811_p13 = por %p810_p12, %p809_p11 }
  0x3e   :  { %642 = vmatpush3.bf16.msra.mxu0 %v641_v7  ;;  %v653_v33 = vpack.c.bf16 %v65_v30, %v64_v28  ;;  %v669_v34 = vpack.c.bf16 %v158_v32, %v157_v31  ;;  %vm654_vm3 = vmpackc.low %vm74_vm1, %vm840_vm2  ;;  %v159_v35 = vld [vmem:[#allocation5 + $0xd0] sm:$0xff]  ;;  %v160_v36 = vld [vmem:[#allocation5 + $0xd8] sm:$0xff] }
  0x3f   :  { %643 = vmatprep.subr.bf16.mxu0 %v837_v0  ;;  %v52_v37 = vld [vmem:[#allocation2] sm:$0xff]  ;;  %v672_v38 = vpack.c.bf16 %v160_v36, %v159_v35  ;;  %v161_v39 = vld [vmem:[#allocation5 + $0xe0] sm:$0xff]  ;;  %v162_v40 = vld [vmem:[#allocation5 + $0xe8] sm:$0xff]  ;;  %v167_v36 = vsub.s32 1, %v927_v5  ;;  %p812_p0 = pnand %p811_p13, %p805_p10 }
  0x40   :  { %661 = vmatpush3.bf16.msra.mxu1 %v660_v17  ;;  %v675_v41 = vpack.c.bf16 %v162_v40, %v161_v39  ;;  %v163_v42 = vld [vmem:[#allocation5 + $0xf0] sm:$0xff]  ;;  %v164_v43 = vld [vmem:[#allocation5 + $0xf8] sm:$0xff]  ;;  %v240_v45 = vld [vmem:[#allocation5 + $0x100] sm:$0xff] }
  0x41   :  { %662 = vmatprep.subr.bf16.mxu1 %v837_v0  ;;  %v678_v44 = vpack.c.bf16 %v164_v43, %v163_v42  ;;  %v241_v46 = vld [vmem:[#allocation5 + $0x108] sm:$0xff]  ;;  %v242_v47 = vld [vmem:[#allocation5 + $0x110] sm:$0xff]  ;;  %v243_v49 = vld [vmem:[#allocation5 + $0x118] sm:$0xff] }
  0x42   :  { %645 = vmatpush3.bf16.msra.mxu0 %v644_v15  ;;  %v681_v48 = vpack.c.bf16 %v241_v46, %v240_v45  ;;  %v684_v50 = vpack.c.bf16 %v243_v49, %v242_v47  ;;  %v244_v51 = vld [vmem:[#allocation5 + $0x120] sm:$0xff]  ;;  %v245_v52 = vld [vmem:[#allocation5 + $0x128] sm:$0xff]  ;;  %v246_v54 = vld [vmem:[#allocation5 + $0x130] sm:$0xff]  ;;  %v258_v45 = vsub.s32 2, %v927_v5 }
  0x43   :  { %646 = vmatprep.subr.bf16.mxu0 %v837_v0  ;;  %v687_v53 = vpack.c.bf16 %v245_v52, %v244_v51  ;;  %v247_v55 = vld [vmem:[#allocation5 + $0x138] sm:$0xff]  ;;  %v248_v57 = vld [vmem:[#allocation5 + $0x140] sm:$0xff]  ;;  %v249_v58 = vld [vmem:[#allocation5 + $0x148] sm:$0xff] }
  0x44   :  { %664 = vmatpush3.bf16.msra.mxu1 %v663_v23  ;;  %v690_v56 = vpack.c.bf16 %v247_v55, %v246_v54  ;;  %v693_v59 = vpack.c.bf16 %v249_v58, %v248_v57  ;;  %v250_v60 = vld [vmem:[#allocation5 + $0x150] sm:$0xff]  ;;  %v251_v61 = vld [vmem:[#allocation5 + $0x158] sm:$0xff]  ;;  %v252_v63 = vld [vmem:[#allocation5 + $0x160] sm:$0xff] }
  0x45   :  { %665 = vmatprep.subr.bf16.mxu1 %v837_v0  ;;  %v696_v62 = vpack.c.bf16 %v251_v61, %v250_v60  ;;  %v253_v2 = vld [vmem:[#allocation5 + $0x168] sm:$0xff]  ;;  %v930_v7 = vld [vmem:[#allocation7] sm:$0xff]  ;;  %v254_v13 = vld [vmem:[#allocation5 + $0x170] sm:$0xff] }
  0x46   :  { %648 = vmatpush3.bf16.msra.mxu0 %v647_v21  ;;  %v699_v3 = vpack.c.bf16 %v253_v2, %v252_v63  ;;  %v69_v8 = vrot.slane %v930_v7, %v68_v6  ;;  %v255_v14 = vld [vmem:[#allocation5 + $0x178] sm:$0xff]  ;;  %v331_v16 = vld [vmem:[#allocation5 + $0x180] sm:$0xff]  ;;  %v332_v17 = vld [vmem:[#allocation5 + $0x188] sm:$0xff]  ;;  %v259_v46 = vrot.slane %v930_v7, %v258_v45 }
  0x47   :  { %649 = vmatprep.subr.bf16.mxu0 %v837_v0  ;;  %v702_v15 = vpack.c.bf16 %v255_v14, %v254_v13  ;;  %v333_v18 = vld [vmem:[#allocation5 + $0x190] sm:$0xff]  ;;  %v705_v19 = vpack.c.bf16 %v332_v17, %v331_v16  ;;  %v334_v20 = vld [vmem:[#allocation5 + $0x198] sm:$0xff]  ;;  %v335_v22 = vld [vmem:[#allocation5 + $0x1a0] sm:$0xff] }
  0x48   :  { %667 = vmatpush3.bf16.msra.mxu1 %v666_v29  ;;  %v708_v21 = vpack.c.bf16 %v334_v20, %v333_v18  ;;  %v336_v23 = vld [vmem:[#allocation5 + $0x1a8] sm:$0xff]  ;;  %v338_v25 = vld [vmem:[#allocation5 + $0x1b8] sm:$0xff]  ;;  %v341_v30 = vld [vmem:[#allocation5 + $0x1d0] sm:$0xff] }
  0x49   :  { %668 = vmatprep.subr.bf16.mxu1 %v837_v0  ;;  %v711_v24 = vpack.c.bf16 %v336_v23, %v335_v22  ;;  %v340_v28 = vld [vmem:[#allocation5 + $0x1c8] sm:$0xff]  ;;  %v342_v31 = vld [vmem:[#allocation5 + $0x1d8] sm:$0xff]  ;;  %v345_v42 = vld [vmem:[#allocation5 + $0x1f0] sm:$0xff] }
  0x4a   :  { %651 = vmatpush3.bf16.msra.mxu0 %v650_v27  ;;  %v339_v27 = vld [vmem:[#allocation5 + $0x1c0] sm:$0xff]  ;;  %v720_v32 = vpack.c.bf16 %v342_v31, %v341_v30  ;;  %v346_v43 = vld [vmem:[#allocation5 + $0x1f8] sm:$0xff] }
  0x4b   :  { %652 = vmatprep.subr.bf16.mxu0 %v837_v0  ;;  %v717_v29 = vpack.c.bf16 %v340_v28, %v339_v27 }
  0x4c   :  { %670 = vmatpush3.bf16.msra.mxu1 %v669_v34  ;;  %v344_v34 = vld [vmem:[#allocation5 + $0x1e8] sm:$0xff] }
  0x4d   :  { %671 = vmatprep.subr.bf16.mxu1 %v837_v0 }
  0x4e   :  { %655 = vmatpush3.bf16.msk.msra.mxu0 %vm654_vm3, %v653_v33  ;;  %v343_v33 = vld [vmem:[#allocation5 + $0x1e0] sm:$0xff] }
  0x4f   :  { %680 = vmatprep.subr.bf16.mxu0 %v837_v0  ;;  %v723_v35 = vpack.c.bf16 %v344_v34, %v343_v33 }
  0x50   :  { %673 = vmatpush3.bf16.msra.mxu1 %v672_v38 }
  0x51   :  { %530 = vmatmul.mubr.msk.f32.vlgmr.msra.gmra.mrb[0].mxu0 %vm70_vm4, %v52_v37  ;;  %674 = vmatprep.subr.bf16.mxu1 %v837_v0  ;;  %v168_v37 = vrot.slane %v930_v7, %v167_v36 }
  0x52   :  { %599 = vmatprep.mubr.msk.f32.mxu0 %vm838_vm0, %v839_v1  ;;  %682 = vmatpush3.bf16.msra.mxu0 %v681_v48 }
  0x53   :  { %683 = vmatprep.subr.bf16.mxu0 %v837_v0 }
  0x54   :  { %676 = vmatpush3.bf16.msra.mxu1 %v675_v41 }
  0x55   :  { %677 = vmatprep.subr.bf16.mxu1 %v837_v0 }
  0x56   :  { %685 = vmatpush3.bf16.msra.mxu0 %v684_v50  ;;  %v349_v50 = vsub.s32 3, %v927_v5 }
  0x57   :  { %686 = vmatprep.subr.bf16.mxu0 %v837_v0 }
  0x58   :  { %679 = vmatpush3.bf16.msra.mxu1 %v678_v44  ;;  %v726_v44 = vpack.c.bf16 %v346_v43, %v345_v42  ;;  %v350_v51 = vrot.slane %v930_v7, %v349_v50 }
  0x59   :  { %704 = vmatprep.subr.bf16.mxu1 %v837_v0 }
  0x5a   :  { %688 = vmatpush3.bf16.msra.mxu0 %v687_v53 }
  0x5b   :  { %689 = vmatprep.subr.bf16.mxu0 %v837_v0 }
  0x5e   :  { %691 = vmatpush3.bf16.msra.mxu0 %v690_v56 }
  0x5f   :  { %692 = vmatprep.subr.bf16.mxu0 %v837_v0 }
  0x62   :  { %694 = vmatpush3.bf16.msra.mxu0 %v693_v59 }
  0x63   :  { %695 = vmatprep.subr.bf16.mxu0 %v837_v0 }
  0x66   :  { %697 = vmatpush3.bf16.msra.mxu0 %v696_v62 }
  0x67   :  { %698 = vmatprep.subr.bf16.mxu0 %v837_v0 }
  0x6a   :  { %700 = vmatpush3.bf16.msra.mxu0 %v699_v3 }
  0x6b   :  { %701 = vmatprep.subr.bf16.mxu0 %v837_v0 }
  0x6e   :  { %703 = vmatpush3.bf16.msra.mxu0 %v702_v15 }
 0x124   :  { %v144_v9 = vpop.f32.mrb[0].mxu0 }
 0x125   :  { %v145_v10 = vadd.f32 %v144_v9, %v69_v8  ;;  %v531_v11 = vpop.f32.mrb[1].mxu0 }
 0x127   :  { %v148_v12 = vmax.f32 %v145_v10, 0.0 }
 0x129   :  { %565 = vmatmul.mubr.f32.vlgmr.msra.gmra.mrb[0].mxu1 %v148_v12 }
 0x12a   :  { %634 = vmatprep.mubr.msk.f32.mxu1 %vm838_vm0, %v839_v1  ;;  %706 = vmatpush3.bf16.msra.mxu1 %v705_v19  ;;  %v337_v1 = vld [vmem:[#allocation5 + $0x1b0] sm:$0xff] }
 0x12b   :  { %707 = vmatprep.subr.bf16.mxu1 %v837_v0  ;;  %v714_v26 = vpack.c.bf16 %v338_v25, %v337_v1 }
 0x12e   :  { %709 = vmatpush3.bf16.msra.mxu1 %v708_v21 }
 0x12f   :  { %710 = vmatprep.subr.bf16.mxu1 %v837_v0 }
 0x132   :  { %712 = vmatpush3.bf16.msra.mxu1 %v711_v24 }
 0x133   :  { %713 = vmatprep.subr.bf16.mxu1 %v837_v0 }
 0x136   :  { %715 = vmatpush3.bf16.msra.mxu1 %v714_v26 }
 0x137   :  { %716 = vmatprep.subr.bf16.mxu1 %v837_v0 }
 0x13a   :  { %718 = vmatpush3.bf16.msra.mxu1 %v717_v29 }
 0x13b   :  { %719 = vmatprep.subr.bf16.mxu1 %v837_v0 }
 0x13e   :  { %721 = vmatpush3.bf16.msra.mxu1 %v720_v32 }
 0x13f   :  { %722 = vmatprep.subr.bf16.mxu1 %v837_v0 }
 0x142   :  { %724 = vmatpush3.bf16.msra.mxu1 %v723_v35 }
 0x143   :  { %725 = vmatprep.subr.bf16.mxu1 %v837_v0 }
 0x146   :  { %727 = vmatpush3.bf16.msra.mxu1 %v726_v44 }
 0x1fc   :  { %v235_v38 = vpop.f32.mrb[0].mxu1 }
 0x1fd   :  { %v236_v39 = vadd.f32 %v235_v38, %v168_v37  ;;  %v566_v40 = vpop.f32.mrb[1].mxu1 }
 0x1ff   :  { %v239_v41 = vmax.f32 %v236_v39, 0.0 }
 0x201   :  { %600 = vmatmul.mubr.f32.vlgmr.msra.gmra.mrb[2].mxu0 %v239_v41 }
 0x2d4   :  { %v326_v47 = vpop.f32.mrb[2].mxu0 }
 0x2d5   :  { %v327_v48 = vadd.f32 %v326_v47, %v259_v46  ;;  %v601_v0 = vpop.f32.mrb[3].mxu0 }
 0x2d7   :  { %v330_v49 = vmax.f32 %v327_v48, 0.0 }
 0x2d9   :  { %635 = vmatmul.mubr.f32.vlgmr.msra.gmra.mrb[2].mxu1 %v330_v49 }
 0x3ac   :  { %v417_v52 = vpop.f32.mrb[2].mxu1 }
 0x3ad   :  { %v418_v53 = vadd.f32 %v417_v52, %v350_v51  ;;  %v636_v54 = vpop.f32.mrb[3].mxu1 }
 0x3af   :  { %422 = vst.msk [vmem:[#allocation8] sm:$0xff] %vm421_vm5, %v418_v53 }
 0x3b0   :  { %815 = shalt.err (!%p812_p0)
}
 0x3b1   :  { %s816_s25 = scalar_lea.hbm %s963_s3, 128 }
 0x3b2   :  { %p817_p1 = scmp.ne.s32.totalorder %s963_s3, %s816_s25  ;;  %p820_p2 = scmp.lt.u32.totalorder %s816_s25, %s963_s3 }
 0x3b4   :  { %p822_p3 = pnand %p820_p2, %p817_p1 }
 0x3b6   :  { %825 = shalt.err (!%p822_p3)
}
 0x3b7   :  { %432 = dma.vmem_to_hbm [thread:$0]  %s430_s21, 128, %s963_s3, [#allocation4]  }
 0x3b8   :  { %830 = dma.done.wait [#allocation4], 128  }
 0x3b9   :  { %831 = vsyncadd [#allocation4], 4294967168 }
 0x3ba   :  { %436 = vsyncpa [#allocation3], 1 }
 0x3bb   :  { %437 = vsyncpa [#allocation6], 1 }
 0x3bc   :  { %438 = vsyncpa [#allocation4], 1 }

</bundles_post_ra>
